<compile_context>
chip_gen: v7x
topology: tpu7x:2x2x1
jax: 0.10.0
libtpu: 0.0.40
codegen_flags: <defaults>
</compile_context>

<pallas_src>
import functools

import jax
import jax.numpy as jnp
from jax.experimental import pallas as pl
from jax.experimental.pallas import tpu as pltpu


def _round_up(a, b):
    return -(-a // b) * b


def _divisors(n):
    ds = set()
    i = 1
    while i * i <= n:
        if n % i == 0:
            ds.add(i)
            ds.add(n // i)
        i += 1
    return sorted(ds)


def _pick_tile(n, cap, aligns=(128, 8, 1)):
    """Largest divisor of n that is <= cap, preferring aligned sizes.

    n itself always counts as aligned (a full-extent block dim is always legal).
    """
    cap = max(1, int(cap))
    divs = _divisors(n)
    for a in aligns:
        best = 0
        for d in divs:
            if d <= cap and (d % a == 0 or d == n):
                best = max(best, d)
        if best:
            return best
    return 1


def _pow_static(x, p):
    """x ** p for x > 0 with static p; integer p -> VPU multiply chain."""
    p = float(p)
    if p == 1.0:
        return x
    if p.is_integer() and 1.0 <= p <= 64.0:
        n = int(p)
        result = None
        base = x
        while n:
            if n & 1:
                result = base if result is None else result * base
            n >>= 1
            if n:
                base = base * base
        return result
    return jnp.power(x, p)  # non-integer p: EUP fallback


def _root_static(x, p):
    """x ** (1/p) for x > 0 with static p (touches only N*C elements)."""
    p = float(p)
    if p == 1.0:
        return x
    if p == 2.0:
        return jnp.sqrt(x)
    return jnp.power(x, 1.0 / p)


def _write_out(o_ref, sums, inv_hw, p):
    # sums: (r_tile, 1) f32 power-sums -> lane-dense (1, r_tile) store.
    mean = sums * inv_hw                       # adaptive_avg_pool2d(1) == spatial mean
    out = _root_static(mean, p).astype(o_ref.dtype)
    o_ref[...] = jnp.transpose(out)            # tiny sublane->lane relayout (XLU)


def _gem_kernel_single(x_ref, o_ref, *, p, eps, inv_hw):
    """Whole H*W per block row: one pass, no scratch accumulator."""
    x = jnp.maximum(x_ref[...].astype(jnp.float32), eps)      # clamp(min=eps)
    xp = _pow_static(x, p)                                     # (r_tile, HW)
    sums = jnp.sum(xp, axis=1, keepdims=True)                  # (r_tile, 1)
    _write_out(o_ref, sums, inv_hw, p)


def _gem_kernel_tiled(x_ref, o_ref, acc_ref, *, p, eps, inv_hw, hw, s_tile, mask_last):
    """H*W tiled along lanes; reduce across the trailing 'arbitrary' grid axis."""
    s_idx = pl.program_id(1)
    n_s = pl.num_programs(1)

    @pl.when(s_idx == 0)
    def _init():
        acc_ref[...] = jnp.zeros_like(acc_ref)

    x = jnp.maximum(x_ref[...].astype(jnp.float32), eps)
    xp = _pow_static(x, p)                                     # (r_tile, s_tile)

    if mask_last:
        # Only the last spatial step can overrun H*W (OOB block lanes are
        # undefined); zero them before accumulating.  Earlier steps take the
        # unmasked fast path (no iota / select).
        @pl.when(s_idx < n_s - 1)
        def _acc_fast():
            acc_ref[...] += jnp.sum(xp, axis=1, keepdims=True)

        @pl.when(s_idx == n_s - 1)
        def _acc_masked():
            pos = jax.lax.broadcasted_iota(jnp.int32, xp.shape, 1) + s_idx * s_tile
            acc_ref[...] += jnp.sum(jnp.where(pos < hw, xp, 0.0), axis=1, keepdims=True)
    else:
        acc_ref[...] += jnp.sum(xp, axis=1, keepdims=True)

    @pl.when(s_idx == n_s - 1)
    def _finalize():
        _write_out(o_ref, acc_ref[...], inv_hw, p)


def _choose_tiles(R, HW, itemsize, target_bytes):
    """Pick (single, r_tile, s_tile, num_s, mask_last) for the (R, HW) view.

    The budget is expressed in f32-equivalent bytes because the in-kernel
    elementwise temporaries (clamp / pow chain) are f32 regardless of the
    input dtype.
    """
    budget_itemsize = max(itemsize, 4)
    lane_hw = _round_up(HW, 128)                       # VMEM lanes for a whole row
    row_budget = lane_hw * budget_itemsize

    if 8 * row_budget <= target_bytes:
        # Common GeM case: the whole H*W row fits on the lane axis.
        cap_rows = max(8, target_bytes // row_budget)
        r_tile = _pick_tile(R, cap_rows)
        # Keep >= 2 parallel row-blocks when an aligned split exists (v7x has
        # two TensorCores sharded over the "parallel" axis; a single block also
        # leaves the double-buffer pipeline with nothing to prefetch).
        if R // r_tile < 2:
            smaller = _pick_tile(R, max(1, R // 2), aligns=(128, 8))
            if smaller >= 8:
                r_tile = smaller
        return True, r_tile, HW, 1, False

    # Huge spatial extent: tile H*W along lanes in 128-multiples and reduce
    # across a trailing "arbitrary" grid axis into a small f32 accumulator.
    r_tile = _pick_tile(R, 64, aligns=(8, 1))
    r_pad = _round_up(r_tile, 8)
    s_cap = max(128, (target_bytes // (r_pad * budget_itemsize)) // 128 * 128)
    s_tile = int(min(lane_hw, s_cap))
    num_s = -(-HW // s_tile)
    mask_last = (HW % s_tile) != 0
    return False, r_tile, s_tile, num_s, mask_last


def generalized_mean_pooling(x, p=3.0, eps=1e-6, *, target_block_bytes=4 * 1024 * 1024):
    """GeM pooling. x: (N, C, H, W) -> (N, C, 1, 1)."""
    N, C, H, W = x.shape
    HW = H * W
    R = N * C
    itemsize = jnp.dtype(x.dtype).itemsize

    single, r_tile, s_tile, num_s, mask_last = _choose_tiles(
        R, HW, itemsize, target_block_bytes)

    xr = x.reshape(R, HW)                       # free: collapses contiguous dims

    # Explicit scoped-VMEM budget: double-buffered input + output blocks,
    # a few f32 elementwise temporaries, the accumulator, and margin.
    lanes = _round_up(HW, 128) if single else s_tile
    r_pad = _round_up(r_tile, 8)
    in_blk = r_pad * lanes * itemsize
    f32_blk = r_pad * lanes * 4
    out_blk = 8 * _round_up(r_tile, 128) * itemsize
    acc_blk = 0 if single else r_pad * 128 * 4
    need = 2 * in_blk + 4 * f32_blk + 2 * out_blk + acc_blk + (4 << 20)
    vmem_limit = int(min(32 << 20, max(16 << 20, need)))

    if single:
        kernel = functools.partial(
            _gem_kernel_single, p=float(p), eps=float(eps), inv_hw=1.0 / float(HW))
        grid = (R // r_tile,)
        in_specs = [pl.BlockSpec((r_tile, HW), lambda r: (r, 0))]
        out_specs = pl.BlockSpec((1, r_tile), lambda r: (0, r))
        scratch_shapes = []
        dims = ("parallel",)
    else:
        kernel = functools.partial(
            _gem_kernel_tiled, p=float(p), eps=float(eps), inv_hw=1.0 / float(HW),
            hw=HW, s_tile=s_tile, mask_last=mask_last)
        grid = (R // r_tile, num_s)
        in_specs = [pl.BlockSpec((r_tile, s_tile), lambda r, s: (r, s))]
        out_specs = pl.BlockSpec((1, r_tile), lambda r, s: (0, r))
        scratch_shapes = [pltpu.VMEM((r_tile, 1), jnp.float32)]
        dims = ("parallel", "arbitrary")

    out = pl.pallas_call(
        kernel,
        out_shape=jax.ShapeDtypeStruct((1, R), x.dtype),
        grid_spec=pltpu.PrefetchScalarGridSpec(
            num_scalar_prefetch=0,
            grid=grid,
            in_specs=in_specs,
            out_specs=out_specs,
            scratch_shapes=scratch_shapes,
        ),
        compiler_params=pltpu.CompilerParams(
            dimension_semantics=dims,
            vmem_limit_bytes=vmem_limit,
        ),
    )(xr)

    return out.reshape(N, C, 1, 1)


if __name__ == "__main__":
    p, eps = 3.0, 1e-6
    k1, k2, k3 = jax.random.split(jax.random.PRNGKey(0), 3)

    def ref_gem(x, p, eps):
        return jnp.power(
            jnp.mean(jnp.power(jnp.maximum(x, eps), p), axis=(2, 3), keepdims=True),
            1.0 / p,
        )

    # Small shape matching the module's NCHW convention (single-shot path).
    x1 = jax.random.uniform(k1, (2, 4, 16, 16), dtype=jnp.float32, minval=-1.0, maxval=1.0)
    y1 = jax.block_until_ready(generalized_mean_pooling(x1, p=p, eps=eps))
    assert y1.shape == (2, 4, 1, 1)
    assert jnp.allclose(y1, ref_gem(x1, p, eps), atol=1e-5, rtol=1e-5)

    # Larger channel count with a non-128-multiple spatial size (single-shot,
    # exercises the >= 2 parallel row-block split).
    x2 = jax.random.uniform(k2, (2, 256, 7, 7), dtype=jnp.float32, minval=-1.0, maxval=1.0)
    y2 = jax.block_until_ready(generalized_mean_pooling(x2, p=p, eps=eps))
    assert y2.shape == (2, 256, 1, 1)
    assert jnp.allclose(y2, ref_gem(x2, p, eps), atol=1e-5, rtol=1e-5)

    # Force the spatially-tiled reduction path (multi-step accumulator + OOB
    # lane mask on the last spatial block) with a tiny block budget.
    x3 = jax.random.uniform(k3, (1, 16, 40, 40), dtype=jnp.float32, minval=-1.0, maxval=1.0)
    y3 = jax.block_until_ready(
        generalized_mean_pooling(x3, p=p, eps=eps, target_block_bytes=16 * 1024))
    assert y3.shape == (1, 16, 1, 1)
    assert jnp.allclose(y3, ref_gem(x3, p, eps), atol=1e-5, rtol=1e-5)

    print("KERNEL_OK")
</pallas_src>

<mosaic_0001>
module attributes {stable_mosaic.version = 11 : i64} {
  func.func @_gem_kernel_single(%arg0: i32, %arg1: memref<8x256xf32, #tpu.memory_space<vmem>>, %arg2: memref<1x8xf32, #tpu.memory_space<vmem>>) attributes {dimension_semantics = [#tpu.dimension_semantics<parallel>], iteration_bounds = array<i64: 1>, scalar_prefetch = 0 : i64, scratch_operands = 0 : i64, tpu.core_type = #tpu.core_type<tc>, window_params = [{transform_indices = @transform_0, window_bounds = array<i64: 8, 256>}, {transform_indices = @transform_1, window_bounds = array<i64: 1, 8>}]} {
    %c0 = arith.constant 0 : index
    %c0_0 = arith.constant 0 : index
    %0 = vector.load %arg1[%c0, %c0_0] : memref<8x256xf32, #tpu.memory_space<vmem>>, vector<8x256xf32>
    %cst = arith.constant 9.99999997E-7 : f32
    %1 = vector.broadcast %cst : f32 to vector<8x256xf32>
    %2 = arith.maximumf %0, %1 : vector<8x256xf32>
    %3 = arith.mulf %2, %2 : vector<8x256xf32>
    %4 = arith.mulf %2, %3 : vector<8x256xf32>
    %cst_1 = arith.constant dense<0.000000e+00> : vector<8xf32>
    %5 = vector.multi_reduction <add>, %4, %cst_1 [1] : vector<8x256xf32> to vector<8xf32>
    %6 = vector.shape_cast %5 : vector<8xf32> to vector<8x1xf32>
    %cst_2 = arith.constant 3.906250e-03 : f32
    %7 = vector.broadcast %cst_2 : f32 to vector<8x1xf32>
    %8 = arith.mulf %6, %7 : vector<8x1xf32>
    %cst_3 = arith.constant 0.333333343 : f32
    %9 = vector.broadcast %cst_3 : f32 to vector<8x1xf32>
    %10 = math.powf %8, %9 : vector<8x1xf32>
    %11 = tpu.transpose %10, [1, 0] : vector<8x1xf32> -> vector<1x8xf32>
    %c0_4 = arith.constant 0 : index
    %c0_5 = arith.constant 0 : index
    %12 = vector.load %arg2[%c0_4, %c0_5] : memref<1x8xf32, #tpu.memory_space<vmem>>, vector<1x8xf32>
    tpu.vector_store %arg2[%c0_4, %c0_5], %11 {strides = array<i32>} : memref<1x8xf32, #tpu.memory_space<vmem>>, vector<1x8xf32>,
    return
  }
  func.func @transform_0(%arg0: i32) -> (i32, i32) {
    %c0_i32 = arith.constant 0 : i32
    %c0_i32_0 = arith.constant 0 : i32
    return %arg0, %c0_i32 : i32, i32
  }
  func.func @transform_1(%arg0: i32) -> (i32, i32) {
    %c0_i32 = arith.constant 0 : i32
    %c0_i32_0 = arith.constant 0 : i32
    return %c0_i32, %arg0 : i32, i32
  }
}

</mosaic_0001>

<bundles_post_ra>
// kernel: tpu_custom_call.1
= control target key start
LH: loop header
LB: loop body
LE: loop exit
PB: predicated region body
PF: predicated region fallthrough
CT: control target
= control target key end

     0   :  { %6 = vsyncpa [#allocation3], 0  ;;  %s192_s0 = inlined_call_operand.hbm [shape: f32[8,256], index: 0, kind: input, shape index: {}]   ;;  %s193_s1 = inlined_call_operand.hbm [shape: f32[1,8], index: 1, kind: output, shape index: {}]  }
   0x1   :  { %7 = vsyncpa [#allocation4], 0  ;;  %s156_s6 = smov [#allocation2]   ;;  %s108_s10 = scalar_lea.hbm %s192_s0, 256 }
   0x2   :  { %s14_s7 = sshll.u32 %s156_s6, 4  ;;  %p109_p0 = scmp.ne.s32.totalorder %s192_s0, %s108_s10  ;;  %s15_s7 = int_to_ptr.vmem [resolvable:$true] %s14_s7 }
   0x3   :  { %p112_p1 = scmp.lt.u32.totalorder %s108_s10, %s192_s0 }
   0x5   :  { %p114_p2 = pnand %p112_p1, %p109_p0 }
   0x7   :  { %117 = shalt.err (!%p114_p2)
}
   0x8   :  { %s118_s15 = scalar_lea.vmem %s15_s7, 256  ;;  %p123_p4 = scmp.lt.s32.totalorder %s15_s7, %s15_s7 }
   0x9   :  { %p119_p3 = scmp.ne.s32.totalorder %s15_s7, %s118_s15  ;;  %p124_p5 = scmp.lt.s32.totalorder %s118_s15, %s118_s15 }
   0xb   :  { %p125_p6 = por %p124_p5, %p123_p4 }
   0xd   :  { %p126_p7 = pnand %p125_p6, %p119_p3 }
   0xf   :  { %129 = shalt.err (!%p126_p7)
}
  0x10   :  { %17 = dma.hbm_to_vmem [thread:$0]  %s192_s0, 256, %s15_s7, [#allocation3]  }
  0x11   :  { %152 = dma.done.wait [#allocation3], 256  }
  0x12   :  { %153 = vsyncadd [#allocation3], 4294967040  ;;  %v21_v0 = vld [vmem:[#allocation2] sm:$0xff]  ;;  %v22_v1 = vld [vmem:[#allocation2 + $0x8] sm:$0xff]  ;;  %s157_s0 = smov [#allocation5]   ;;  %vm66_vm5 = vcmask 57344  }
  0x13   :  { %v23_v2 = vmax.f32 %v21_v0, 1e-06  ;;  %v24_v3 = vmax.f32 %v22_v1, 1e-06  ;;  %s74_s18 = sshll.u32 %s157_s0, 4  ;;  %s75_s18 = int_to_ptr.vmem [resolvable:$true] %s74_s18 }
  0x14   :  { %s130_s19 = scalar_lea.vmem %s75_s18, 16  ;;  %s134_s20 = scalar_lea.vmem %s75_s18, 32 }
  0x15   :  { %v25_v4 = vmul.f32 %v23_v2, %v23_v2  ;;  %v26_v5 = vmul.f32 %v24_v3, %v24_v3  ;;  %p131_p8 = scmp.ne.s32.totalorder %s75_s18, %s130_s19  ;;  %p135_p9 = scmp.lt.s32.totalorder %s75_s18, %s75_s18 }
  0x16   :  { %p136_p10 = scmp.lt.s32.totalorder %s134_s20, %s130_s19 }
  0x17   :  { %v27_v6 = vmul.f32 %v25_v4, %v23_v2  ;;  %v28_v7 = vmul.f32 %v26_v5, %v24_v3 }
  0x18   :  { %p137_p11 = por %p136_p10, %p135_p9 }
  0x19   :  { %v29_v8 = vadd.f32 %v28_v7, %v27_v6 }
  0x1a   :  { %p138_p12 = pnand %p137_p11, %p131_p8 }
  0x1b   :  { %30 = vadd.xlane.f32.xlu0 %v29_v8 }
  0xa8   :  { %v31_v9 = vpop.xlane.xlu0 %30 }
  0xa9   :  { %v32_v10 = vmul.f32 0.00390625, %v31_v9 }
  0xab   :  { %v85_v11 = vand.u32 2147483647, %v32_v10  ;;  %v89_v14 = vand.u32 2147483648, %v32_v10  ;;  %vm84_vm2 = vcmp.lt.f32.partialorder %v32_v10, 0.0  ;;  %vm83_vm3 = vcmp.eq.f32.partialorder %v32_v10, 0.0 }
  0xad   :  { %104 = vlog2.f32 %v85_v11  ;;  %vm93_vm0 = vweird.f32 %v85_v11  ;;  %vm95_vm1 = vcmp.eq.f32.partialorder %v85_v11, 0.0  ;;  %vm86_vm4 = vcmp.eq.f32.partialorder %v85_v11, inf }
  0xb7   :  { %v105_v12 = vpop.eup %104 }
  0xb8   :  { %v90_v13 = vmul.f32 0.33333334, %v105_v12 }
  0xba   :  { %106 = vpow2.f32 %v90_v13 }
  0xc4   :  { %v107_v15 = vpop.eup %106 }
  0xc5   :  { %v92_v16 = vor.u32 %v107_v15, %v89_v14 }
  0xc7   :  { %v94_v17 = vsel %vm93_vm0, %v32_v10, %v92_v16 }
  0xc8   :  { %v97_v18 = vsel %vm95_vm1, %v89_v14, %v94_v17 }
  0xc9   :  { %v98_v19 = vsel %vm84_vm2, nan, %v97_v18 }
  0xca   :  { %v99_v20 = vsel %vm83_vm3, 0.0, %v98_v19 }
  0xcb   :  { %v100_v21 = vsel %vm86_vm4, inf, %v99_v20 }
  0xcc   :  { %34 = vxpose.xlu0.b32.start.end [1/1] (short) (narrow) %v100_v21, 8 }
 0x14c   :  { %v50_v22 = vpop.trf.xlu0 }
 0x14d   :  { %67 = vst.msk [vmem:[#allocation5] sm:$0x1] %vm66_vm5, %v50_v22 }
 0x14e   :  { %141 = shalt.err (!%p138_p12)
}
 0x14f   :  { %s142_s23 = scalar_lea.hbm %s193_s1, 16 }
 0x150   :  { %p143_p13 = scmp.ne.s32.totalorder %s193_s1, %s142_s23  ;;  %p146_p0 = scmp.lt.u32.totalorder %s142_s23, %s193_s1 }
 0x152   :  { %p148_p1 = pnand %p146_p0, %p143_p13 }
 0x154   :  { %151 = shalt.err (!%p148_p1)
}
 0x155   :  { %77 = dma.vmem_to_hbm [thread:$0]  %s75_s18, 16, %s193_s1, [#allocation4]  }
 0x156   :  { %154 = dma.done.wait [#allocation4], 16  }
 0x157   :  { %155 = vsyncadd [#allocation4], 4294967280 }
 0x158   :  { %81 = vsyncpa [#allocation3], 1 }
 0x159   :  { %82 = vsyncpa [#allocation4], 1 }

</bundles_post_ra>
